<compile_context>
chip_gen: v6e
topology: v6e:2x2x1
jax: 0.10.0
libtpu: 0.0.40
codegen_flags: <defaults>
</compile_context>

<pallas_src>
import functools

import jax
import jax.numpy as jnp
from jax.experimental import pallas as pl
from jax.experimental.pallas import tpu as pltpu


def _pick_tile(dim, candidates):
    for c in candidates:
        if dim % c == 0:
            return c
    return dim


# ----------------------------------------------------------------------------
# Pallas kernels
# ----------------------------------------------------------------------------
def _linear_kernel(x_ref, w_ref, b_ref, o_ref, acc_ref, *, activation):
    """Tiled matmul + bias + optional activation.  Grid = (M, N, K) tiles."""
    k = pl.program_id(2)

    @pl.when(k == 0)
    def _():
        acc_ref[...] = jnp.zeros_like(acc_ref)

    acc_ref[...] += jnp.dot(
        x_ref[...], w_ref[...], preferred_element_type=jnp.float32
    )

    @pl.when(k == pl.num_programs(2) - 1)
    def _():
        y = acc_ref[...] + b_ref[...]
        if activation == "gelu":
            # TODO(synk): HF BertIntermediate uses exact (erf) GELU; tanh
            # approximation is used here for a guaranteed Mosaic lowering.
            y = jax.nn.gelu(y, approximate=True)
        elif activation == "tanh":
            y = jnp.tanh(y)
        elif activation == "relu":
            y = jnp.maximum(y, 0.0)
        o_ref[...] = y.astype(o_ref.dtype)


def linear(x, w, b, activation="none", out_dtype=jnp.bfloat16):
    M, K = x.shape
    K2, N = w.shape
    assert K == K2
    x = x.astype(jnp.bfloat16)
    w = w.astype(jnp.bfloat16)
    b = b.astype(jnp.float32).reshape(1, N)

    tm = _pick_tile(M, (512, 256, 128))
    tk = _pick_tile(K, (512, 256, 128))
    tn = _pick_tile(N, (512, 256, 128))
    nm, nn_, nk = M // tm, N // tn, K // tk

    return pl.pallas_call(
        functools.partial(_linear_kernel, activation=activation),
        out_shape=jax.ShapeDtypeStruct((M, N), out_dtype),
        grid_spec=pltpu.PrefetchScalarGridSpec(
            num_scalar_prefetch=0,
            grid=(nm, nn_, nk),
            in_specs=[
                pl.BlockSpec((tm, tk), lambda i, j, k: (i, k)),
                pl.BlockSpec((tk, tn), lambda i, j, k: (k, j)),
                pl.BlockSpec((1, tn), lambda i, j, k: (0, j)),
            ],
            out_specs=pl.BlockSpec((tm, tn), lambda i, j, k: (i, j)),
            scratch_shapes=[pltpu.VMEM((tm, tn), jnp.float32)],
        ),
        compiler_params=pltpu.CompilerParams(
            dimension_semantics=("parallel", "parallel", "arbitrary")
        ),
    )(x, w, b)


def _layernorm_kernel(x_ref, *rest, eps, has_residual):
    """LayerNorm over the last axis, with optional fused residual add."""
    if has_residual:
        r_ref, g_ref, b_ref, o_ref = rest
        x = x_ref[...].astype(jnp.float32) + r_ref[...].astype(jnp.float32)
    else:
        g_ref, b_ref, o_ref = rest
        x = x_ref[...].astype(jnp.float32)
    mean = jnp.mean(x, axis=-1, keepdims=True)
    c = x - mean
    var = jnp.mean(c * c, axis=-1, keepdims=True)
    y = c * jax.lax.rsqrt(var + eps)
    o_ref[...] = (
        y * g_ref[...].astype(jnp.float32) + b_ref[...].astype(jnp.float32)
    ).astype(o_ref.dtype)


def layernorm(x, g, b, residual=None, eps=1e-12, out_dtype=jnp.bfloat16):
    M, H = x.shape
    tm = _pick_tile(M, (1024, 512, 256))
    nm = M // tm

    operands = [x]
    in_specs = [pl.BlockSpec((tm, H), lambda i: (i, 0))]
    if residual is not None:
        operands.append(residual)
        in_specs.append(pl.BlockSpec((tm, H), lambda i: (i, 0)))
    operands += [g.reshape(1, H), b.reshape(1, H)]
    in_specs += [
        pl.BlockSpec((1, H), lambda i: (0, 0)),
        pl.BlockSpec((1, H), lambda i: (0, 0)),
    ]

    return pl.pallas_call(
        functools.partial(
            _layernorm_kernel, eps=eps, has_residual=residual is not None
        ),
        out_shape=jax.ShapeDtypeStruct((M, H), out_dtype),
        grid_spec=pltpu.PrefetchScalarGridSpec(
            num_scalar_prefetch=0,
            grid=(nm,),
            in_specs=in_specs,
            out_specs=pl.BlockSpec((tm, H), lambda i: (i, 0)),
        ),
        compiler_params=pltpu.CompilerParams(dimension_semantics=("parallel",)),
    )(*operands)


def _attention_kernel(q_ref, k_ref, v_ref, bias_ref, o_ref, *, scale):
    """One batch element per grid step: all heads at once.

    softmax(q k^T * scale + bias) v, bf16 MXU operands, f32 accumulate.
    """
    q = q_ref[0]                       # (nH, S, Dh) bf16
    k = k_ref[0]
    v = v_ref[0]
    s = jnp.einsum("hqd,hkd->hqk", q, k, preferred_element_type=jnp.float32)
    s = s * scale + bias_ref[0]        # (1, S) bias broadcasts over key axis
    m = jnp.max(s, axis=-1, keepdims=True)
    p = jnp.exp(s - m)
    denom = jnp.sum(p, axis=-1, keepdims=True)
    p = p * pl.reciprocal(denom, approx=True)
    ctx = jnp.einsum(
        "hqk,hkd->hqd", p.astype(v.dtype), v, preferred_element_type=jnp.float32
    )
    o_ref[0] = ctx.astype(o_ref.dtype)


def attention(q, k, v, bias, scale):
    B, nH, S, Dh = q.shape
    return pl.pallas_call(
        functools.partial(_attention_kernel, scale=scale),
        out_shape=jax.ShapeDtypeStruct((B, nH, S, Dh), q.dtype),
        grid_spec=pltpu.PrefetchScalarGridSpec(
            num_scalar_prefetch=0,
            grid=(B,),
            in_specs=[
                pl.BlockSpec((1, nH, S, Dh), lambda b: (b, 0, 0, 0)),
                pl.BlockSpec((1, nH, S, Dh), lambda b: (b, 0, 0, 0)),
                pl.BlockSpec((1, nH, S, Dh), lambda b: (b, 0, 0, 0)),
                pl.BlockSpec((1, 1, S), lambda b: (b, 0, 0)),
            ],
            out_specs=pl.BlockSpec((1, nH, S, Dh), lambda b: (b, 0, 0, 0)),
        ),
        compiler_params=pltpu.CompilerParams(dimension_semantics=("parallel",)),
    )(q, k, v, bias)


def _pooler_classifier_kernel(cls_ref, wp_ref, bp_ref, wc_ref, bc_ref, o_ref):
    """Fused pooler(tanh) -> dropout(eval=identity) -> Linear(768,4) -> ReLU."""
    x = cls_ref[...]                                            # (B, H) bf16
    pooled = jnp.tanh(
        jnp.dot(x, wp_ref[...], preferred_element_type=jnp.float32)
        + bp_ref[...]
    )
    # TODO(synk): nn.Dropout(0.5) is identity in eval mode; matching torch's
    # training-mode RNG is not reproducible here (would use pltpu.prng_random_bits).
    logits = (
        jnp.dot(
            pooled.astype(wc_ref.dtype),
            wc_ref[...],
            preferred_element_type=jnp.float32,
        )
        + bc_ref[...]
    )
    o_ref[...] = jnp.maximum(logits, 0.0).astype(o_ref.dtype)


def pooler_classifier(cls, wp, bp, wc, bc):
    B, H = cls.shape
    C = wc.shape[1]
    return pl.pallas_call(
        _pooler_classifier_kernel,
        out_shape=jax.ShapeDtypeStruct((B, C), jnp.float32),
        grid_spec=pltpu.PrefetchScalarGridSpec(
            num_scalar_prefetch=0,
            grid=(1,),
            in_specs=[
                pl.BlockSpec((B, H), lambda i: (0, 0)),
                pl.BlockSpec((H, H), lambda i: (0, 0)),
                pl.BlockSpec((1, H), lambda i: (0, 0)),
                pl.BlockSpec((H, C), lambda i: (0, 0)),
                pl.BlockSpec((1, C), lambda i: (0, 0)),
            ],
            out_specs=pl.BlockSpec((B, C), lambda i: (0, 0)),
        ),
    )(
        cls.astype(jnp.bfloat16),
        wp.astype(jnp.bfloat16),
        bp.astype(jnp.float32).reshape(1, H),
        wc.astype(jnp.bfloat16),
        bc.astype(jnp.float32).reshape(1, C),
    )


# ----------------------------------------------------------------------------
# Parameter init (deterministic, synthetic; weights stored bf16, biases f32)
# ----------------------------------------------------------------------------
def init_params(key, cfg):
    H, I, C = cfg["hidden"], cfg["intermediate"], cfg["num_classes"]

    def dense(key, fan_in, fan_out):
        w = jax.random.normal(key, (fan_in, fan_out), jnp.float32) * 0.02
        return w.astype(jnp.bfloat16)

    keys = iter(jax.random.split(key, 64))
    params = {
        "word_emb": jax.random.normal(next(keys), (cfg["vocab"], H)) * 0.02,
        "pos_emb": jax.random.normal(next(keys), (cfg["max_pos"], H)) * 0.02,
        "type_emb": jax.random.normal(next(keys), (2, H)) * 0.02,
        "emb_ln_g": jnp.ones((H,), jnp.float32),
        "emb_ln_b": jnp.zeros((H,), jnp.float32),
        "layers": [],
        "wp": dense(next(keys), H, H),
        "bp": jnp.zeros((H,), jnp.float32),
        "wc": dense(next(keys), H, C),
        "bc": jnp.zeros((C,), jnp.float32),
    }
    for _ in range(cfg["layers"]):
        layer = {
            # fused Q/K/V projection: columns [0:H]=Q, [H:2H]=K, [2H:3H]=V
            "wqkv": dense(next(keys), H, 3 * H),
            "bqkv": jnp.zeros((3 * H,), jnp.float32),
            "wo": dense(next(keys), H, H),
            "bo": jnp.zeros((H,), jnp.float32),
            "ln1_g": jnp.ones((H,), jnp.float32),
            "ln1_b": jnp.zeros((H,), jnp.float32),
            "wi": dense(next(keys), H, I),
            "bi": jnp.zeros((I,), jnp.float32),
            "wd": dense(next(keys), I, H),
            "bd": jnp.zeros((H,), jnp.float32),
            "ln2_g": jnp.ones((H,), jnp.float32),
            "ln2_b": jnp.zeros((H,), jnp.float32),
        }
        params["layers"].append(layer)
    return params


# ----------------------------------------------------------------------------
# Forward pass (glue in JAX; hot paths in Pallas kernels above)
# ----------------------------------------------------------------------------
def bert_classifier_forward(params, input_ids, attention_mask, cfg):
    B, S = input_ids.shape
    H, nH = cfg["hidden"], cfg["heads"]
    Dh = H // nH

    # Embeddings (table gathers stay in plain JAX glue).
    we = params["word_emb"][input_ids]                      # (B,S,H)
    pe = params["pos_emb"][jnp.arange(S)][None]             # (1,S,H)
    te = params["type_emb"][0][None, None]                  # (1,1,H) token_type=0
    emb = (we + pe + te).reshape(B * S, H)
    h = layernorm(emb, params["emb_ln_g"], params["emb_ln_b"])
    # (embedding dropout is identity in eval mode)

    # Additive padding bias, kept at its natural (B,1,S) size and broadcast
    # inside the attention kernel (no (B*nH,S,S) materialization).
    bias = ((1.0 - attention_mask.astype(jnp.float32)) * -1e9).reshape(B, 1, S)
    scale = 1.0 / (Dh ** 0.5)

    for layer in params["layers"]:
        # Fused QKV projection: one pass over `h`, (B*S, 3H) output.
        qkv = linear(h, layer["wqkv"], layer["bqkv"])
        qkv = qkv.reshape(B, S, 3, nH, Dh).transpose(2, 0, 3, 1, 4)  # (3,B,nH,S,Dh)
        ctx = attention(qkv[0], qkv[1], qkv[2], bias, scale)         # (B,nH,S,Dh)
        ctx = ctx.transpose(0, 2, 1, 3).reshape(B * S, H)

        attn_out = linear(ctx, layer["wo"], layer["bo"])
        h = layernorm(attn_out, layer["ln1_g"], layer["ln1_b"], residual=h)

        inter = linear(h, layer["wi"], layer["bi"], activation="gelu")
        ffn_out = linear(inter, layer["wd"], layer["bd"])
        h = layernorm(ffn_out, layer["ln2_g"], layer["ln2_b"], residual=h)

    # Pooler + dropout(eval) + Linear(768,4) + ReLU, fused in one tiny kernel.
    cls = h.reshape(B, S, H)[:, 0, :]                        # (B, H) [CLS] rows
    logits = pooler_classifier(cls, params["wp"], params["bp"],
                               params["wc"], params["bc"])
    return logits


# ----------------------------------------------------------------------------
if __name__ == "__main__":
    cfg = dict(
        hidden=768,        # keeps the exact Linear(768, 4) classifier semantics
        heads=12,
        layers=2,          # scaled down from 12 (synthetic weights anyway)
        intermediate=3072,
        vocab=128,
        max_pos=64,
        num_classes=4,
    )
    B, S = 2, 8

    root = jax.random.PRNGKey(0)
    k_params, k_ids = jax.random.split(root)
    params = init_params(k_params, cfg)

    input_id = jax.random.randint(k_ids, (B, S), 0, cfg["vocab"], dtype=jnp.int32)
    lengths = jnp.array([S, 5], dtype=jnp.int32)
    mask = (jnp.arange(S)[None, :] < lengths[:, None]).astype(jnp.int32)

    out = bert_classifier_forward(params, input_id, mask, cfg)
    out = jax.block_until_ready(out)
    assert out.shape == (B, cfg["num_classes"])
    assert out.dtype == jnp.float32
    print("KERNEL_OK")
</pallas_src>

<mosaic_0001>
module attributes {stable_mosaic.version = 11 : i64} {
  func.func @_layernorm_kernel(%arg0: i32, %arg1: memref<16x768xf32, #tpu.memory_space<vmem>>, %arg2: memref<1x768xf32, #tpu.memory_space<vmem>>, %arg3: memref<1x768xf32, #tpu.memory_space<vmem>>, %arg4: memref<16x768xbf16, #tpu.memory_space<vmem>>) attributes {dimension_semantics = [#tpu.dimension_semantics<parallel>], iteration_bounds = array<i64: 1>, scalar_prefetch = 0 : i64, scratch_operands = 0 : i64, tpu.core_type = #tpu.core_type<tc>, window_params = [{transform_indices = @transform_0, window_bounds = array<i64: 16, 768>}, {pipeline_mode = #tpu.pipeline_mode<synchronous>, transform_indices = @transform_1, window_bounds = array<i64: 1, 768>}, {pipeline_mode = #tpu.pipeline_mode<synchronous>, transform_indices = @transform_2, window_bounds = array<i64: 1, 768>}, {transform_indices = @transform_3, window_bounds = array<i64: 16, 768>}]} {
    %c0 = arith.constant 0 : index
    %c0_0 = arith.constant 0 : index
    %0 = vector.load %arg1[%c0, %c0_0] : memref<16x768xf32, #tpu.memory_space<vmem>>, vector<16x768xf32>
    %cst = arith.constant dense<0.000000e+00> : vector<16xf32>
    %1 = vector.multi_reduction <add>, %0, %cst [1] : vector<16x768xf32> to vector<16xf32>
    %2 = vector.shape_cast %1 : vector<16xf32> to vector<16x1xf32>
    %cst_1 = arith.constant 7.680000e+02 : f32
    %3 = vector.broadcast %cst_1 : f32 to vector<16x1xf32>
    %4 = arith.divf %2, %3 : vector<16x1xf32>
    %5 = vector.broadcast %4 : vector<16x1xf32> to vector<16x768xf32>
    %6 = arith.subf %0, %5 : vector<16x768xf32>
    %7 = arith.mulf %6, %6 : vector<16x768xf32>
    %cst_2 = arith.constant dense<0.000000e+00> : vector<16xf32>
    %8 = vector.multi_reduction <add>, %7, %cst_2 [1] : vector<16x768xf32> to vector<16xf32>
    %9 = vector.shape_cast %8 : vector<16xf32> to vector<16x1xf32>
    %cst_3 = arith.constant 7.680000e+02 : f32
    %10 = vector.broadcast %cst_3 : f32 to vector<16x1xf32>
    %11 = arith.divf %9, %10 : vector<16x1xf32>
    %cst_4 = arith.constant 9.99999996E-13 : f32
    %12 = vector.broadcast %cst_4 : f32 to vector<16x1xf32>
    %13 = arith.addf %11, %12 : vector<16x1xf32>
    %14 = math.rsqrt %13 : vector<16x1xf32>
    %15 = vector.broadcast %14 : vector<16x1xf32> to vector<16x768xf32>
    %16 = arith.mulf %6, %15 : vector<16x768xf32>
    %c0_5 = arith.constant 0 : index
    %c0_6 = arith.constant 0 : index
    %17 = vector.load %arg2[%c0_5, %c0_6] : memref<1x768xf32, #tpu.memory_space<vmem>>, vector<1x768xf32>
    %18 = vector.broadcast %17 : vector<1x768xf32> to vector<16x768xf32>
    %19 = arith.mulf %16, %18 : vector<16x768xf32>
    %c0_7 = arith.constant 0 : index
    %c0_8 = arith.constant 0 : index
    %20 = vector.load %arg3[%c0_7, %c0_8] : memref<1x768xf32, #tpu.memory_space<vmem>>, vector<1x768xf32>
    %21 = vector.broadcast %20 : vector<1x768xf32> to vector<16x768xf32>
    %22 = arith.addf %19, %21 : vector<16x768xf32>
    %23 = arith.truncf %22 : vector<16x768xf32> to vector<16x768xbf16>
    %c0_9 = arith.constant 0 : index
    %c0_10 = arith.constant 0 : index
    %24 = vector.load %arg4[%c0_9, %c0_10] : memref<16x768xbf16, #tpu.memory_space<vmem>>, vector<16x768xbf16>
    tpu.vector_store %arg4[%c0_9, %c0_10], %23 {strides = array<i32>} : memref<16x768xbf16, #tpu.memory_space<vmem>>, vector<16x768xbf16>,
    return
  }
  func.func @transform_0(%arg0: i32) -> (i32, i32) {
    %c0_i32 = arith.constant 0 : i32
    %c0_i32_0 = arith.constant 0 : i32
    return %arg0, %c0_i32 : i32, i32
  }
  func.func @transform_1(%arg0: i32) -> (i32, i32) {
    %c0_i32 = arith.constant 0 : i32
    %c0_i32_0 = arith.constant 0 : i32
    %c0_i32_1 = arith.constant 0 : i32
    return %c0_i32, %c0_i32_0 : i32, i32
  }
  func.func @transform_2(%arg0: i32) -> (i32, i32) {
    %c0_i32 = arith.constant 0 : i32
    %c0_i32_0 = arith.constant 0 : i32
    %c0_i32_1 = arith.constant 0 : i32
    return %c0_i32, %c0_i32_0 : i32, i32
  }
  func.func @transform_3(%arg0: i32) -> (i32, i32) {
    %c0_i32 = arith.constant 0 : i32
    %c0_i32_0 = arith.constant 0 : i32
    return %arg0, %c0_i32 : i32, i32
  }
}

</mosaic_0001>

<bundles_post_ra>
// kernel: tpu_custom_call.1
= control target key start
LH: loop header
LB: loop body
LE: loop exit
PB: predicated region body
PF: predicated region fallthrough
CT: control target
= control target key end

     0   :  { %8 = vsyncpa [#allocation3], 0  ;;  %s480_s0 = inlined_call_operand.hbm [shape: f32[16,768], index: 0, kind: input, shape index: {}]   ;;  %s481_s1 = inlined_call_operand.hbm [shape: f32[1,768], index: 1, kind: input, shape index: {}]   ;;  %s482_s2 = inlined_call_operand.hbm [shape: f32[1,768], index: 2, kind: input, shape index: {}]   ;;  %s483_s3 = inlined_call_operand.hbm [shape: bf16[16,768], index: 3, kind: output, shape index: {}]  }
   0x1   :  { %9 = vsyncpa [#allocation6], 0 }
   0x2   :  { %10 = vsyncpa [#allocation4], 0  ;;  %s395_s12 = smov [#allocation5]   ;;  %s396_s14 = smov [#allocation2]  }
   0x3   :  { %s29_s13 = sshll.u32 %s395_s12, 4  ;;  %s16_s15 = sshll.u32 %s396_s14, 4  ;;  %s30_s13 = int_to_ptr.vmem [resolvable:$true] %s29_s13  ;;  %s17_s15 = int_to_ptr.vmem [resolvable:$true] %s16_s15 }
   0x4   :  { %s317_s16 = scalar_lea.vmem %s30_s13, 96  ;;  %p322_p1 = scmp.lt.s32.totalorder %s30_s13, %s30_s13 }
   0x5   :  { %p318_p0 = scmp.ne.s32.totalorder %s30_s13, %s317_s16  ;;  %p323_p2 = scmp.lt.s32.totalorder %s317_s16, %s317_s16 }
   0x7   :  { %p324_p3 = por %p323_p2, %p322_p1 }
   0x9   :  { %p325_p4 = pnand %p324_p3, %p318_p0 }
   0xb   :  { %328 = shalt.err (!%p325_p4)
}
   0xc   :  { %32 = dma.hbm_to_vmem [thread:$0]  %s481_s1, 96, %s30_s13, [#allocation6]  }
   0xd   :  { %s337_s19 = scalar_lea.vmem %s17_s15, 1536  ;;  %p342_p6 = scmp.lt.s32.totalorder %s17_s15, %s17_s15 }
   0xe   :  { %p338_p5 = scmp.ne.s32.totalorder %s17_s15, %s337_s19  ;;  %p343_p7 = scmp.lt.s32.totalorder %s337_s19, %s337_s19 }
  0x10   :  { %p344_p8 = por %p343_p7, %p342_p6 }
  0x12   :  { %p345_p9 = pnand %p344_p8, %p338_p5 }
  0x14   :  { %348 = shalt.err (!%p345_p9)
}
  0x15   :  { %s397_s20 = smov 768   ;;  %s398_s21 = smov 48  }
  0x16   :  { %22 = dma.hbm_to_vmem [thread:$0]  %s480_s0, 1536, %s17_s15, [#allocation3], %s397_s20, %s397_s20, %s398_s21  }
  0x17   :  { %s399_s24 = smov [#allocation7]  }
  0x18   :  { %s39_s25 = sshll.u32 %s399_s24, 4  ;;  %s40_s25 = int_to_ptr.vmem [resolvable:$true] %s39_s25 }
  0x19   :  { %s357_s26 = scalar_lea.vmem %s40_s25, 96  ;;  %p362_p11 = scmp.lt.s32.totalorder %s40_s25, %s40_s25 }
  0x1a   :  { %p358_p10 = scmp.ne.s32.totalorder %s40_s25, %s357_s26  ;;  %p363_p12 = scmp.lt.s32.totalorder %s357_s26, %s357_s26 }
  0x1c   :  { %p364_p13 = por %p363_p12, %p362_p11 }
  0x1e   :  { %p365_p0 = pnand %p364_p13, %p358_p10 }
  0x20   :  { %368 = shalt.err (!%p365_p0)
}
  0x21   :  { %42 = dma.hbm_to_vmem [thread:$0]  %s482_s2, 96, %s40_s25, [#allocation6]  }
  0x22   :  { %389 = dma.done.wait [#allocation3], 1536  }
  0x23   :  { %390 = vsyncadd [#allocation3], 4294965760 }
  0x24   :  { %391 = dma.done.wait [#allocation6], 192  }
  0x25   :  { %392 = vsyncadd [#allocation6], 4294967104  ;;  %v52_v0 = vld [vmem:[#allocation2] sm:$0xff]  ;;  %v53_v1 = vld [vmem:[#allocation2 + $0x8] sm:$0xff]  ;;  %s400_s0 = smov [#allocation8]  }
  0x26   :  { %v54_v2 = vld [vmem:[#allocation2 + $0x10] sm:$0xff]  ;;  %v55_v3 = vld [vmem:[#allocation2 + $0x18] sm:$0xff]  ;;  %v64_v4 = vadd.f32 %v53_v1, %v52_v0  ;;  %v60_v7 = vld [vmem:[#allocation2 + $0x40] sm:$0xff]  ;;  %s272_s2 = sshll.u32 %s400_s0, 4  ;;  %s273_s2 = int_to_ptr.vmem [resolvable:$true] %s272_s2 }
  0x27   :  { %v58_v5 = vld [vmem:[#allocation2 + $0x30] sm:$0xff]  ;;  %v59_v6 = vld [vmem:[#allocation2 + $0x38] sm:$0xff]  ;;  %v56_v10 = vld [vmem:[#allocation2 + $0x20] sm:$0xff]  ;;  %s369_s28 = scalar_lea.vmem %s273_s2, 768  ;;  %p374_p2 = scmp.lt.s32.totalorder %s273_s2, %s273_s2 }
  0x28   :  { %v65_v8 = vadd.f32 %v64_v4, %v54_v2  ;;  %v71_v9 = vadd.f32 %v59_v6, %v58_v5  ;;  %v61_v11 = vld [vmem:[#allocation2 + $0x48] sm:$0xff]  ;;  %v62_v15 = vld [vmem:[#allocation2 + $0x50] sm:$0xff]  ;;  %v63_v18 = vld [vmem:[#allocation2 + $0x58] sm:$0xff]  ;;  %p370_p1 = scmp.ne.s32.totalorder %s273_s2, %s369_s28  ;;  %p375_p3 = scmp.lt.s32.totalorder %s369_s28, %s369_s28 }
  0x29   :  { %v57_v14 = vld [vmem:[#allocation2 + $0x28] sm:$0xff] }
  0x2a   :  { %v66_v12 = vadd.f32 %v65_v8, %v55_v3  ;;  %v72_v13 = vadd.f32 %v71_v9, %v60_v7  ;;  %v137_v8 = vld [vmem:[#allocation5] sm:$0x3f]  ;;  %p376_p4 = por %p375_p3, %p374_p2 }
  0x2c   :  { %v67_v16 = vadd.f32 %v66_v12, %v56_v10  ;;  %v73_v17 = vadd.f32 %v72_v13, %v61_v11  ;;  %p377_p5 = pnand %p376_p4, %p370_p1 }
  0x2e   :  { %v68_v19 = vadd.f32 %v67_v16, %v57_v14  ;;  %v74_v20 = vadd.f32 %v73_v17, %v62_v15 }
  0x30   :  { %69 = vadd.xlane.f32.xlu0 %v68_v19  ;;  %v75_v21 = vadd.f32 %v74_v20, %v63_v18 }
  0x34   :  { %76 = vadd.xlane.f32.xlu0 %v75_v21 }
  0xb9   :  { %v70_v22 = vpop.xlane.xlu0 %69 }
  0xba   :  { %v79_v23 = vmul.f32 0.0013020834, %v70_v22 }
  0xbc   :  { %v432_v24 = vsub.f32 %v52_v0, %v79_v23  ;;  %v434_v25 = vsub.f32 %v53_v1, %v79_v23  ;;  %v436_v26 = vsub.f32 %v54_v2, %v79_v23  ;;  %v438_v28 = vsub.f32 %v55_v3, %v79_v23 }
  0xbd   :  { %v77_v27 = vpop.xlane.xlu0 %76  ;;  %v85_v32 = vsub.f32 %v56_v10, %v79_v23  ;;  %v86_v38 = vsub.f32 %v57_v14, %v79_v23  ;;  %v139_v1 = vlaneseq }
  0xbe   :  { %v80_v29 = vmul.f32 0.0013020834, %v77_v27  ;;  %v93_v30 = vmul.f32 %v432_v24, %v432_v24  ;;  %v94_v31 = vmul.f32 %v434_v25, %v434_v25  ;;  %v95_v33 = vmul.f32 %v436_v26, %v436_v26 }
  0xbf   :  { %v96_v39 = vmul.f32 %v438_v28, %v438_v28  ;;  %v97_v44 = vmul.f32 %v85_v32, %v85_v32  ;;  %v98_v49 = vmul.f32 %v86_v38, %v86_v38  ;;  %v140_v3 = vshrl.u32 %v139_v1, 7 }
  0xc0   :  { %v105_v34 = vadd.f32 %v94_v31, %v93_v30  ;;  %v446_v35 = vsub.f32 %v58_v5, %v80_v29  ;;  %v448_v36 = vsub.f32 %v59_v6, %v80_v29  ;;  %v450_v37 = vsub.f32 %v60_v7, %v80_v29 }
  0xc1   :  { %v454_v41 = vsub.f32 %v61_v11, %v80_v29  ;;  %v460_v46 = vsub.f32 %v62_v15, %v80_v29  ;;  %v92_v51 = vsub.f32 %v63_v18, %v80_v29  ;;  %v141_v4 = vsub.s32 0, %v140_v3  ;;  %v181_v11 = vld [vmem:[#allocation7] sm:$0x3f] }
  0xc2   :  { %v106_v40 = vadd.f32 %v105_v34, %v95_v33  ;;  %v99_v42 = vmul.f32 %v446_v35, %v446_v35  ;;  %v100_v43 = vmul.f32 %v448_v36, %v448_v36  ;;  %v101_v47 = vmul.f32 %v450_v37, %v450_v37 }
  0xc3   :  { %v102_v52 = vmul.f32 %v454_v41, %v454_v41  ;;  %v103_v55 = vmul.f32 %v460_v46, %v460_v46  ;;  %v104_v57 = vmul.f32 %v92_v51, %v92_v51  ;;  %v145_v5 = vsub.s32 1, %v140_v3 }
  0xc4   :  { %v107_v45 = vadd.f32 %v106_v40, %v96_v39  ;;  %v112_v48 = vadd.f32 %v100_v43, %v99_v42  ;;  %v149_v6 = vsub.s32 2, %v140_v3  ;;  %v153_v7 = vsub.s32 3, %v140_v3 }
  0xc5   :  { %v157_v9 = vsub.s32 4, %v140_v3  ;;  %v161_v10 = vsub.s32 5, %v140_v3  ;;  %v142_v12 = vrot.slane %v137_v8, %v141_v4  ;;  %v146_v13 = vrot.slane %v137_v8, %v145_v5 }
  0xc6   :  { %v108_v50 = vadd.f32 %v107_v45, %v97_v44  ;;  %v113_v53 = vadd.f32 %v112_v48, %v101_v47  ;;  %v150_v14 = vrot.slane %v137_v8, %v149_v6  ;;  %v154_v15 = vrot.slane %v137_v8, %v153_v7 }
  0xc7   :  { %v158_v17 = vrot.slane %v137_v8, %v157_v9  ;;  %v162_v18 = vrot.slane %v137_v8, %v161_v10  ;;  %v186_v19 = vrot.slane %v181_v11, %v141_v4  ;;  %v190_v20 = vrot.slane %v181_v11, %v145_v5 }
  0xc8   :  { %v109_v54 = vadd.f32 %v108_v50, %v98_v49  ;;  %v114_v56 = vadd.f32 %v113_v53, %v102_v52  ;;  %v194_v31 = vrot.slane %v181_v11, %v149_v6  ;;  %v198_v33 = vrot.slane %v181_v11, %v153_v7 }
  0xc9   :  { %v202_v40 = vrot.slane %v181_v11, %v157_v9  ;;  %v206_v42 = vrot.slane %v181_v11, %v161_v10 }
  0xca   :  { %110 = vadd.xlane.f32.xlu1 %v109_v54  ;;  %v115_v58 = vadd.f32 %v114_v56, %v103_v55 }
  0xcc   :  { %v116_v59 = vadd.f32 %v115_v58, %v104_v57 }
  0xce   :  { %117 = vadd.xlane.f32.xlu1 %v116_v59 }
 0x153   :  { %v111_v60 = vpop.xlane.xlu1 %110 }
 0x154   :  { %v119_v61 = vmul.f32 0.0013020834, %v111_v60 }
 0x156   :  { %v121_v62 = vadd.f32 1e-12, %v119_v61 }
 0x157   :  { %v118_v63 = vpop.xlane.xlu1 %117 }
 0x158   :  { %305 = vrsqrt.f32 %v121_v62  ;;  %v120_v0 = vmul.f32 0.0013020834, %v118_v63 }
 0x15a   :  { %v122_v2 = vadd.f32 1e-12, %v120_v0 }
 0x15c   :  { %307 = vrsqrt.f32 %v122_v2 }
 0x165   :  { %v306_v16 = vpop.eup %305 }
 0x166   :  { %v125_v21 = vmul.f32 %v306_v16, %v432_v24  ;;  %v126_v22 = vmul.f32 %v306_v16, %v434_v25  ;;  %v127_v23 = vmul.f32 %v306_v16, %v436_v26  ;;  %v128_v27 = vmul.f32 %v306_v16, %v438_v28 }
 0x167   :  { %v129_v29 = vmul.f32 %v306_v16, %v85_v32  ;;  %v130_v30 = vmul.f32 %v306_v16, %v86_v38 }
 0x168   :  { %v169_v34 = vmul.f32 %v142_v12, %v125_v21  ;;  %v170_v39 = vmul.f32 %v146_v13, %v126_v22  ;;  %v171_v44 = vmul.f32 %v150_v14, %v127_v23  ;;  %v172_v45 = vmul.f32 %v154_v15, %v128_v27 }
 0x169   :  { %v308_v43 = vpop.eup %307  ;;  %v173_v47 = vmul.f32 %v158_v17, %v129_v29  ;;  %v174_v48 = vmul.f32 %v162_v18, %v130_v30 }
 0x16a   :  { %v131_v24 = vmul.f32 %v308_v43, %v446_v35  ;;  %v132_v25 = vmul.f32 %v308_v43, %v448_v36  ;;  %v133_v26 = vmul.f32 %v308_v43, %v450_v37  ;;  %v134_v28 = vmul.f32 %v308_v43, %v454_v41 }
 0x16b   :  { %v135_v32 = vmul.f32 %v308_v43, %v460_v46  ;;  %v136_v38 = vmul.f32 %v308_v43, %v92_v51  ;;  %v213_v49 = vadd.f32 %v186_v19, %v169_v34  ;;  %v214_v50 = vadd.f32 %v190_v20, %v170_v39 }
 0x16c   :  { %v175_v52 = vmul.f32 %v142_v12, %v131_v24  ;;  %v176_v53 = vmul.f32 %v146_v13, %v132_v25  ;;  %v177_v54 = vmul.f32 %v150_v14, %v133_v26  ;;  %v178_v55 = vmul.f32 %v154_v15, %v134_v28 }
 0x16d   :  { %v179_v56 = vmul.f32 %v158_v17, %v135_v32  ;;  %v180_v57 = vmul.f32 %v162_v18, %v136_v38  ;;  %v215_v58 = vadd.f32 %v194_v31, %v171_v44  ;;  %v216_v59 = vadd.f32 %v198_v33, %v172_v45 }
 0x16e   :  { %v217_v35 = vadd.f32 %v202_v40, %v173_v47  ;;  %v218_v60 = vadd.f32 %v206_v42, %v174_v48  ;;  %v219_v36 = vadd.f32 %v186_v19, %v175_v52  ;;  %v220_v61 = vadd.f32 %v190_v20, %v176_v53 }
 0x16f   :  { %v221_v37 = vadd.f32 %v194_v31, %v177_v54  ;;  %v222_v41 = vadd.f32 %v198_v33, %v178_v55  ;;  %v223_v46 = vadd.f32 %v202_v40, %v179_v56  ;;  %v224_v51 = vadd.f32 %v206_v42, %v180_v57 }
 0x170   :  { %v291_v62 = vpack.c.bf16 %v214_v50, %v213_v49  ;;  %v292_v63 = vpack.c.bf16 %v216_v59, %v215_v58  ;;  %v293_v0 = vpack.c.bf16 %v218_v60, %v217_v35  ;;  %v294_v1 = vpack.c.bf16 %v220_v61, %v219_v36 }
 0x171   :  { %v295_v2 = vpack.c.bf16 %v222_v41, %v221_v37  ;;  %v296_v3 = vpack.c.bf16 %v224_v51, %v223_v46 }
 0x172   :  { %261 = vst [vmem:[#allocation8] sm:$0xff] %v291_v62  ;;  %262 = vst [vmem:[#allocation8 + $0x8] sm:$0xff] %v292_v63 }
 0x173   :  { %263 = vst [vmem:[#allocation8 + $0x10] sm:$0xff] %v293_v0  ;;  %264 = vst [vmem:[#allocation8 + $0x18] sm:$0xff] %v294_v1 }
 0x174   :  { %265 = vst [vmem:[#allocation8 + $0x20] sm:$0xff] %v295_v2  ;;  %266 = vst [vmem:[#allocation8 + $0x28] sm:$0xff] %v296_v3 }
 0x175   :  { %380 = shalt.err (!%p377_p5)
}
 0x176   :  { %s401_s29 = smov 384   ;;  %s402_s30 = smov 24  }
 0x177   :  { %278 = dma.vmem_to_hbm [thread:$0]  %s273_s2, 768, %s483_s3, [#allocation4], %s401_s29, %s401_s29, %s402_s30  }
 0x178   :  { %393 = dma.done.wait [#allocation4], 768  }
 0x179   :  { %394 = vsyncadd [#allocation4], 4294966528 }
 0x17a   :  { %282 = vsyncpa [#allocation3], 1 }
 0x17b   :  { %283 = vsyncpa [#allocation6], 1 }
 0x17c   :  { %284 = vsyncpa [#allocation4], 1 }

</bundles_post_ra>
